<compile_context>
chip_gen: v5e
topology: v5e:2x2
jax: 0.10.0
libtpu: 0.0.40
codegen_flags: <defaults>
</compile_context>

<pallas_src>
from functools import partial

import jax
import jax.numpy as jnp
from jax.experimental import pallas as pl
from jax.experimental.pallas import tpu as pltpu

LANES = 128               # vreg lane width: last block dim must be a multiple of 128
TILE_ROWS = 4096          # (4096, 128) f32 tile = 2 MiB; in+out double-buffered = 8 MiB VMEM
MIN_PALLAS_ELEMS = 1024   # below one (8,128) vreg-slab of work, plain XLA elementwise wins


def _linreg_kernel(b_ref, w_ref, x_ref, o_ref):
    # b_ref, w_ref: SMEM scalars of shape (1,)
    # x_ref, o_ref: VMEM tiles of shape (tile_rows, 128)
    o_ref[...] = b_ref[0] + w_ref[0] * x_ref[...]


def _linreg_pallas_2d(x2d: jax.Array, w: jax.Array, b: jax.Array) -> jax.Array:
    """Runs the tiled kernel on a lane-dense (rows, 128) f32 slab."""
    rows = x2d.shape[0]
    # tile_rows is either the full row extent (small inputs) or 4096
    # (a multiple of 8), so the (8, 128) BlockSpec rule is always satisfied.
    tile_rows = min(TILE_ROWS, rows)
    grid = (pl.cdiv(rows, tile_rows),)   # ragged last block is fine

    return pl.pallas_call(
        _linreg_kernel,
        out_shape=jax.ShapeDtypeStruct((rows, LANES), x2d.dtype),
        grid=grid,
        in_specs=[
            pl.BlockSpec(memory_space=pltpu.SMEM),               # b (scalar)
            pl.BlockSpec(memory_space=pltpu.SMEM),               # w (scalar)
            pl.BlockSpec((tile_rows, LANES), lambda i: (i, 0)),  # x tile
        ],
        out_specs=pl.BlockSpec((tile_rows, LANES), lambda i: (i, 0)),
        compiler_params=pltpu.CompilerParams(
            dimension_semantics=("parallel",),
        ),
        cost_estimate=pl.CostEstimate(
            flops=2 * rows * LANES,
            transcendentals=0,
            bytes_accessed=2 * rows * LANES * 4,  # one read + one write pass
        ),
    )(b, w, x2d)


@partial(jax.jit, static_argnames=("force_pallas",))
def manual_linear_regression(x: jax.Array, w: jax.Array, b: jax.Array,
                             *, force_pallas: bool = False) -> jax.Array:
    """Computes b + w * x (ManualLinearRegression.forward).

    x: (N, 1) float32, w: (1,) float32, b: (1,) float32 -> (N, 1) float32.
    """
    N, F = x.shape
    n = N * F

    if not force_pallas and n < MIN_PALLAS_ELEMS:
        # Tiny input: kernel launch + pad/reshape dispatch would dominate;
        # let XLA emit a single fused elementwise op instead.
        return b + w * x

    flat = x.reshape(-1)
    rows = pl.cdiv(n, LANES)
    padded = rows * LANES
    if padded != n:
        # Pad only to the 128-lane boundary (<= 127 extra elements).
        flat = jnp.pad(flat, (0, padded - n))
    x2d = flat.reshape(rows, LANES)

    out2d = _linreg_pallas_2d(x2d, w, b)

    out_flat = out2d.reshape(-1)
    if padded != n:
        out_flat = out_flat[:n]
    return out_flat.reshape(N, F)


if __name__ == "__main__":
    key = jax.random.PRNGKey(0)
    k_x, k_w, k_b = jax.random.split(key, 3)

    N = 100  # matches the reference script's N = 100
    x = jax.random.uniform(k_x, (N, 1), dtype=jnp.float32)   # torch.rand-like input
    w = jax.random.normal(k_w, (1,), dtype=jnp.float32)      # torch.randn-like params
    b = jax.random.normal(k_b, (1,), dtype=jnp.float32)

    y_ref = b + w * x

    # Force the Pallas path so the kernel itself is exercised at the demo size
    # (exercises the pad + ragged single-block path).
    y = jax.block_until_ready(manual_linear_regression(x, w, b, force_pallas=True))
    assert y.shape == (N, 1)
    assert y.dtype == jnp.float32
    assert jnp.allclose(y, y_ref, rtol=1e-6, atol=1e-6)

    # Public entry point (tiny-input fast path) must match as well.
    y2 = jax.block_until_ready(manual_linear_regression(x, w, b))
    assert jnp.allclose(y2, y_ref, rtol=1e-6, atol=1e-6)

    # A 128-aligned size: no pad, no output slice, still routed through Pallas.
    N3 = 1024
    x3 = jax.random.uniform(k_x, (N3, 1), dtype=jnp.float32)
    y3 = jax.block_until_ready(manual_linear_regression(x3, w, b))
    assert jnp.allclose(y3, b + w * x3, rtol=1e-6, atol=1e-6)

    print("KERNEL_OK")
</pallas_src>

<mosaic_0001>
module attributes {stable_mosaic.version = 11 : i64} {
  func.func @_linreg_kernel(%arg0: i32, %arg1: memref<1xf32, #tpu.memory_space<smem>>, %arg2: memref<1xf32, #tpu.memory_space<smem>>, %arg3: memref<1x128xf32, #tpu.memory_space<vmem>>, %arg4: memref<1x128xf32, #tpu.memory_space<vmem>>) attributes {dimension_semantics = [#tpu.dimension_semantics<parallel>], iteration_bounds = array<i64: 1>, scalar_prefetch = 0 : i64, scratch_operands = 0 : i64, tpu.core_type = #tpu.core_type<tc>, window_params = [{transform_indices = @transform_0, window_bounds = array<i64: 1>}, {transform_indices = @transform_1, window_bounds = array<i64: 1>}, {transform_indices = @transform_2, window_bounds = array<i64: 1, 128>}, {transform_indices = @transform_3, window_bounds = array<i64: 1, 128>}]} {
    %c0 = arith.constant 0 : index
    %0 = memref.load %arg1[%c0] : memref<1xf32, #tpu.memory_space<smem>>
    %c0_0 = arith.constant 0 : index
    %1 = memref.load %arg2[%c0_0] : memref<1xf32, #tpu.memory_space<smem>>
    %c0_1 = arith.constant 0 : index
    %c0_2 = arith.constant 0 : index
    %2 = vector.load %arg3[%c0_1, %c0_2] : memref<1x128xf32, #tpu.memory_space<vmem>>, vector<1x128xf32>
    %3 = vector.broadcast %1 : f32 to vector<1x128xf32>
    %4 = arith.mulf %3, %2 : vector<1x128xf32>
    %5 = vector.broadcast %0 : f32 to vector<1x128xf32>
    %6 = arith.addf %5, %4 : vector<1x128xf32>
    %c0_3 = arith.constant 0 : index
    %c0_4 = arith.constant 0 : index
    %7 = vector.load %arg4[%c0_3, %c0_4] : memref<1x128xf32, #tpu.memory_space<vmem>>, vector<1x128xf32>
    tpu.vector_store %arg4[%c0_3, %c0_4], %6 {strides = array<i32>} : memref<1x128xf32, #tpu.memory_space<vmem>>, vector<1x128xf32>,
    return
  }
  func.func @transform_0(%arg0: i32) -> i32 {
    %c0_i32 = arith.constant 0 : i32
    %c0_i32_0 = arith.constant 0 : i32
    return %c0_i32 : i32
  }
  func.func @transform_1(%arg0: i32) -> i32 {
    %c0_i32 = arith.constant 0 : i32
    %c0_i32_0 = arith.constant 0 : i32
    return %c0_i32 : i32
  }
  func.func @transform_2(%arg0: i32) -> (i32, i32) {
    %c0_i32 = arith.constant 0 : i32
    %c0_i32_0 = arith.constant 0 : i32
    return %arg0, %c0_i32 : i32, i32
  }
  func.func @transform_3(%arg0: i32) -> (i32, i32) {
    %c0_i32 = arith.constant 0 : i32
    %c0_i32_0 = arith.constant 0 : i32
    return %arg0, %c0_i32 : i32, i32
  }
}

</mosaic_0001>

<bundles_post_ra>
// kernel: manual_linear_regression.1
= control target key start
LH: loop header
LB: loop body
LE: loop exit
PB: predicated region body
PF: predicated region fallthrough
CT: control target
= control target key end

     0   :  { %s60_s0 = inlined_call_operand.<no memory space> [shape: f32[1], index: 0, kind: input, shape index: {}]   ;;  %s61_s1 = inlined_call_operand.<no memory space> [shape: f32[1], index: 1, kind: input, shape index: {}]   ;;  %s62_s2 = inlined_call_operand.vmem [shape: f32[1,128], index: 2, kind: input, shape index: {}]   ;;  %s63_s3 = inlined_call_operand.vmem [shape: f32[1,128], index: 3, kind: output, shape index: {}]  }
   0x1   :  { %v18_v0 = vld [vmem:[%s62_s2] sm:$0x1]  ;;  %v19_v1 = vstv %s61_s1  ;;  %v21_v2 = vstv %s60_s0 }
   0x2   :  { %v20_v3 = vmul.f32 %v19_v1, %v18_v0 }
   0x4   :  { %v22_v4 = vadd.f32 %v21_v2, %v20_v3 }
   0x6   :  { %23 = vst [vmem:[%s63_s3] sm:$0x1] %v22_v4 }

</bundles_post_ra>
